<compile_context>
chip_gen: v5e
topology: v5e:2x2
jax: 0.10.0
libtpu: 0.0.40
codegen_flags: <defaults>
</compile_context>

<pallas_src>
import functools

import jax
import jax.numpy as jnp
from jax.experimental import pallas as pl
from jax.experimental.pallas import tpu as pltpu


# ------------------------------ fused kernel --------------------------------

def _mistral_block_kernel(
    x_ref,            # (T, C)        one batch row-block
    wqkv_ref,         # (C, 3*HD)     ln1 weight & 1/sqrt(Dh) folded in; K/V GQA-expanded
    wo_ref,           # (HD, C)
    wgu_ref,          # (C, 2*hidden) ln2 weight folded in
    wdown_ref,        # (hidden, C)
    cos_ref,          # (T, 3*HD)     RoPE cos (ones over the V slice)
    sin_ref,          # (T, 3*HD)     RoPE sin (zeros over the V slice)
    rot_ref,          # (3*HD, 3*HD)  block-diag rotate_half (zero block for V)
    maskkv_ref,       # (H*T, HD)     0/1 block-diag head mask for sublane-tiled K/V
    swa_ref,          # (T, H*T)      additive sliding-window-causal bias (0 / -1e30)
    onesbd_ref,       # (H*T, H*T)    block-diag ones (per-head softmax denom, pre-broadcast)
    o_ref,            # (T, C)
    *, n_head, head_dim, eps,
):
    f32 = jnp.float32
    x = x_ref[...].astype(f32)
    HD = n_head * head_dim

    def rms(v):  # RMSNorm without weight (weight is folded into the following matmul)
        return v * jax.lax.rsqrt(jnp.mean(v * v, axis=-1, keepdims=True) + eps)

    # ---------------- attention branch ----------------
    qkv = jnp.dot(rms(x), wqkv_ref[...], preferred_element_type=f32)          # (T, 3*HD)
    # RoPE (rotate-half) on Q and K in one fused matmul; V slice passes through untouched.
    # TODO(synk): MistralRoPE source not provided; standard HF rotate-half RoPE assumed.
    qkv = qkv * cos_ref[...] + jnp.dot(qkv, rot_ref[...],
                                       preferred_element_type=f32) * sin_ref[...]

    q = qkv[:, :HD]            # (T, HD)   scale already folded into the projection
    k = qkv[:, HD:2 * HD]      # (T, HD)   GQA-expanded
    v = qkv[:, 2 * HD:]        # (T, HD)   GQA-expanded

    # Lane-packed block-diagonal attention: all heads in one set of MXU ops.
    mask_kv = maskkv_ref[...]
    k_bd = jnp.tile(k, (n_head, 1)) * mask_kv          # (H*T, HD)
    v_bd = jnp.tile(v, (n_head, 1)) * mask_kv          # (H*T, HD)

    s = jax.lax.dot_general(q, k_bd, (((1,), (1,)), ((), ())),
                            preferred_element_type=f32)                       # (T, H*T)
    s = s + swa_ref[...]                               # finite mask -> no NaN rows possible
    m = jnp.max(s, axis=-1, keepdims=True)             # shared row max; per-segment invariant
    p = jnp.exp(s - m)
    denom = jnp.dot(p, onesbd_ref[...], preferred_element_type=f32)           # per-head row sums
    p = p * pl.reciprocal(denom, approx=True)          # divide on the EUP slot
    attn = jnp.dot(p, v_bd, preferred_element_type=f32)                       # (T, HD) lane-packed

    h = x + jnp.dot(attn, wo_ref[...], preferred_element_type=f32)            # residual

    # ---------------- MLP branch (SwiGLU) ----------------
    gu = jnp.dot(rms(h), wgu_ref[...], preferred_element_type=f32)            # (T, 2*hidden)
    hidden = wdown_ref.shape[0]
    g = gu[:, :hidden]
    u = gu[:, hidden:]
    mlp = jnp.dot(g * jax.nn.sigmoid(g) * u, wdown_ref[...],
                  preferred_element_type=f32)
    # attn/resid/mlp dropout skipped (dropout=0.0 / eval)

    o_ref[...] = (h + mlp).astype(o_ref.dtype)


# ------------------------------ host-side prep -------------------------------

def rope_tables(T, Dh, theta=10000.0):
    inv_freq = 1.0 / (theta ** (jnp.arange(0, Dh, 2, dtype=jnp.float32) / Dh))
    t = jnp.arange(T, dtype=jnp.float32)
    freqs = jnp.outer(t, inv_freq)                       # (T, Dh/2)
    emb = jnp.concatenate([freqs, freqs], axis=-1)       # (T, Dh)
    return jnp.cos(emb), jnp.sin(emb)


def rotate_half_matrix(Dh):
    # (x @ R)[j] = -x[j + Dh/2] for j < Dh/2, else x[j - Dh/2]  == rotate_half(x)
    half = Dh // 2
    R = jnp.zeros((Dh, Dh), jnp.float32)
    R = R.at[jnp.arange(half) + half, jnp.arange(half)].set(-1.0)
    R = R.at[jnp.arange(half), jnp.arange(half) + half].set(1.0)
    return R


def fuse_block_inputs(params, T, n_head, n_kv_head, head_dim, window_size):
    """One-time fusion of weights, RoPE tables and masks into the packed kernel layout."""
    C = params["wq"].shape[0]
    HD = n_head * head_dim
    repeats = n_head // n_kv_head
    scale = 1.0 / (head_dim ** 0.5)

    # GQA repeat_interleave folded into the weight pack.
    def expand_kv(w):  # (C, Hkv*Dh) -> (C, H*Dh)
        return jnp.repeat(w.reshape(C, n_kv_head, head_dim), repeats, axis=1).reshape(C, HD)

    wqkv = jnp.concatenate(
        [params["wq"] * scale, expand_kv(params["wk"]), expand_kv(params["wv"])], axis=1)
    wqkv = params["ln1_w"][:, None] * wqkv                                   # fold RMSNorm weight
    wgu = params["ln2_w"][:, None] * jnp.concatenate(
        [params["w_gate"], params["w_up"]], axis=1)                          # fold RMSNorm weight

    # RoPE tables over the full packed qkv width (V slice: cos=1, sin=0 -> pass-through).
    cos, sin = rope_tables(T, head_dim)                  # (T, Dh)
    cos_qk = jnp.tile(cos, (1, n_head))                  # (T, HD)
    sin_qk = jnp.tile(sin, (1, n_head))
    cos_qkv = jnp.concatenate([cos_qk, cos_qk, jnp.ones((T, HD), jnp.float32)], axis=1)
    sin_qkv = jnp.concatenate([sin_qk, sin_qk, jnp.zeros((T, HD), jnp.float32)], axis=1)

    R = rotate_half_matrix(head_dim)
    rot_heads = jnp.kron(jnp.eye(n_head, dtype=jnp.float32), R)              # (HD, HD)
    rot_qkv = jax.scipy.linalg.block_diag(
        rot_heads, rot_heads, jnp.zeros((HD, HD), jnp.float32))              # (3HD, 3HD)

    # Block-diagonal head masks for lane-packed attention.
    head_rows = jnp.repeat(jnp.arange(n_head), T)                            # (H*T,)
    head_cols = jnp.repeat(jnp.arange(n_head), head_dim)                     # (HD,)
    mask_kv = (head_rows[:, None] == head_cols[None, :]).astype(jnp.float32)  # (H*T, HD)
    ones_bd = (head_rows[:, None] == head_rows[None, :]).astype(jnp.float32)  # (H*T, H*T)

    # Sliding-window causal additive bias, tiled across heads along lanes.
    ii = jnp.arange(T)[:, None]
    jj = jnp.arange(T)[None, :]
    allowed = (jj <= ii) & ((ii - jj) < window_size)
    swa = jnp.where(allowed, 0.0, -1e30).astype(jnp.float32)                 # (T, T)
    swa_bias = jnp.tile(swa, (1, n_head))                                    # (T, H*T)

    return {
        "wqkv": wqkv, "wo": params["wo"], "wgu": wgu, "wdown": params["w_down"],
        "cos_qkv": cos_qkv, "sin_qkv": sin_qkv, "rot_qkv": rot_qkv,
        "mask_kv": mask_kv, "swa_bias": swa_bias, "ones_bd": ones_bd,
    }


def mistral_block(x, fused, *, n_head, head_dim, eps=1e-6):
    B, T, C = x.shape
    kernel = functools.partial(_mistral_block_kernel,
                               n_head=n_head, head_dim=head_dim, eps=eps)

    rows = lambda b: (b, 0)     # per-batch (T, C) row block
    whole = lambda b: (0, 0)    # weights / tables stay resident across the grid

    order = ("wqkv", "wo", "wgu", "wdown", "cos_qkv", "sin_qkv",
             "rot_qkv", "mask_kv", "swa_bias", "ones_bd")
    const_specs = [pl.BlockSpec(fused[name].shape, whole) for name in order]

    out = pl.pallas_call(
        kernel,
        out_shape=jax.ShapeDtypeStruct((B * T, C), x.dtype),
        grid_spec=pltpu.PrefetchScalarGridSpec(
            num_scalar_prefetch=0,
            grid=(B,),
            in_specs=[pl.BlockSpec((T, C), rows)] + const_specs,
            out_specs=pl.BlockSpec((T, C), rows)),
        compiler_params=pltpu.CompilerParams(dimension_semantics=("parallel",)),
    )(x.reshape(B * T, C), *[fused[name] for name in order])
    return out.reshape(B, T, C)


# --------------------------------- params ------------------------------------

def init_params(key, n_embd, n_head, n_kv_head, head_dim, hidden_dim):
    ks = jax.random.split(key, 7)
    s = 0.02
    return {
        "ln1_w": jnp.ones((n_embd,), jnp.float32),
        "ln2_w": jnp.ones((n_embd,), jnp.float32),
        "wq": jax.random.normal(ks[0], (n_embd, n_head * head_dim), jnp.float32) * s,
        "wk": jax.random.normal(ks[1], (n_embd, n_kv_head * head_dim), jnp.float32) * s,
        "wv": jax.random.normal(ks[2], (n_embd, n_kv_head * head_dim), jnp.float32) * s,
        "wo": jax.random.normal(ks[3], (n_head * head_dim, n_embd), jnp.float32) * s,
        "w_gate": jax.random.normal(ks[4], (n_embd, hidden_dim), jnp.float32) * s,
        "w_up": jax.random.normal(ks[5], (n_embd, hidden_dim), jnp.float32) * s,
        "w_down": jax.random.normal(ks[6], (hidden_dim, n_embd), jnp.float32) * s,
    }


# ---------------------------------- main --------------------------------------

if __name__ == "__main__":
    B, T = 2, 8
    n_embd, n_head, n_kv_head, head_dim = 32, 4, 2, 8
    hidden_dim, window_size = 64, 4
    assert n_head * head_dim == n_embd

    root = jax.random.PRNGKey(0)
    k_x, k_p = jax.random.split(root)
    x = jax.random.normal(k_x, (B, T, n_embd), jnp.float32)
    params = init_params(k_p, n_embd, n_head, n_kv_head, head_dim, hidden_dim)

    # One-time weight/table/mask fusion (done outside the jitted forward).
    fused = jax.tree_util.tree_map(
        jax.block_until_ready,
        fuse_block_inputs(params, T, n_head, n_kv_head, head_dim, window_size))

    fwd = jax.jit(functools.partial(mistral_block, n_head=n_head, head_dim=head_dim))

    out = fwd(x, fused)
    jax.block_until_ready(out)
    assert out.shape == (B, T, n_embd) and out.dtype == jnp.float32
    assert bool(jnp.all(jnp.isfinite(out)))
    print("KERNEL_OK")
</pallas_src>

<mosaic_0001>
module attributes {stable_mosaic.version = 11 : i64} {
  func.func @_mistral_block_kernel(%arg0: i32, %arg1: memref<8x32xf32, #tpu.memory_space<vmem>>, %arg2: memref<32x96xf32, #tpu.memory_space<vmem>>, %arg3: memref<32x32xf32, #tpu.memory_space<vmem>>, %arg4: memref<32x128xf32, #tpu.memory_space<vmem>>, %arg5: memref<64x32xf32, #tpu.memory_space<vmem>>, %arg6: memref<8x96xf32, #tpu.memory_space<vmem>>, %arg7: memref<8x96xf32, #tpu.memory_space<vmem>>, %arg8: memref<96x96xf32, #tpu.memory_space<vmem>>, %arg9: memref<32x32xf32, #tpu.memory_space<vmem>>, %arg10: memref<8x32xf32, #tpu.memory_space<vmem>>, %arg11: memref<32x32xf32, #tpu.memory_space<vmem>>, %arg12: memref<8x32xf32, #tpu.memory_space<vmem>>) attributes {dimension_semantics = [#tpu.dimension_semantics<parallel>], iteration_bounds = array<i64: 2>, scalar_prefetch = 0 : i64, scratch_operands = 0 : i64, tpu.core_type = #tpu.core_type<tc>, window_params = [{transform_indices = @transform_0, window_bounds = array<i64: 8, 32>}, {pipeline_mode = #tpu.pipeline_mode<synchronous>, transform_indices = @transform_1, window_bounds = array<i64: 32, 96>}, {pipeline_mode = #tpu.pipeline_mode<synchronous>, transform_indices = @transform_2, window_bounds = array<i64: 32, 32>}, {pipeline_mode = #tpu.pipeline_mode<synchronous>, transform_indices = @transform_3, window_bounds = array<i64: 32, 128>}, {pipeline_mode = #tpu.pipeline_mode<synchronous>, transform_indices = @transform_4, window_bounds = array<i64: 64, 32>}, {pipeline_mode = #tpu.pipeline_mode<synchronous>, transform_indices = @transform_5, window_bounds = array<i64: 8, 96>}, {pipeline_mode = #tpu.pipeline_mode<synchronous>, transform_indices = @transform_6, window_bounds = array<i64: 8, 96>}, {pipeline_mode = #tpu.pipeline_mode<synchronous>, transform_indices = @transform_7, window_bounds = array<i64: 96, 96>}, {pipeline_mode = #tpu.pipeline_mode<synchronous>, transform_indices = @transform_8, window_bounds = array<i64: 32, 32>}, {pipeline_mode = #tpu.pipeline_mode<synchronous>, transform_indices = @transform_9, window_bounds = array<i64: 8, 32>}, {pipeline_mode = #tpu.pipeline_mode<synchronous>, transform_indices = @transform_10, window_bounds = array<i64: 32, 32>}, {transform_indices = @transform_11, window_bounds = array<i64: 8, 32>}]} {
    %c0 = arith.constant 0 : index
    %c0_0 = arith.constant 0 : index
    %0 = vector.load %arg1[%c0, %c0_0] : memref<8x32xf32, #tpu.memory_space<vmem>>, vector<8x32xf32>
    %1 = arith.mulf %0, %0 : vector<8x32xf32>
    %cst = arith.constant dense<0.000000e+00> : vector<8xf32>
    %2 = vector.multi_reduction <add>, %1, %cst [1] : vector<8x32xf32> to vector<8xf32>
    %3 = vector.shape_cast %2 : vector<8xf32> to vector<8x1xf32>
    %cst_1 = arith.constant 3.200000e+01 : f32
    %4 = vector.broadcast %cst_1 : f32 to vector<8x1xf32>
    %5 = arith.divf %3, %4 : vector<8x1xf32>
    %cst_2 = arith.constant 9.99999997E-7 : f32
    %6 = vector.broadcast %cst_2 : f32 to vector<8x1xf32>
    %7 = arith.addf %5, %6 : vector<8x1xf32>
    %8 = math.rsqrt %7 : vector<8x1xf32>
    %9 = vector.broadcast %8 : vector<8x1xf32> to vector<8x32xf32>
    %10 = arith.mulf %0, %9 : vector<8x32xf32>
    %c0_3 = arith.constant 0 : index
    %c0_4 = arith.constant 0 : index
    %11 = vector.load %arg2[%c0_3, %c0_4] : memref<32x96xf32, #tpu.memory_space<vmem>>, vector<32x96xf32>
    %cst_5 = arith.constant dense<0.000000e+00> : vector<8x96xf32>
    %12 = tpu.matmul %10, %11, %cst_5 {dimension_numbers = #tpu.dot_dimension_numbers<[1], [0], [0], [1], [0, 0, 1, 1], [], []>} : vector<8x32xf32>, vector<32x96xf32>, vector<8x96xf32> -> vector<8x96xf32>
    %c0_6 = arith.constant 0 : index
    %c0_7 = arith.constant 0 : index
    %13 = vector.load %arg6[%c0_6, %c0_7] : memref<8x96xf32, #tpu.memory_space<vmem>>, vector<8x96xf32>
    %14 = arith.mulf %12, %13 : vector<8x96xf32>
    %c0_8 = arith.constant 0 : index
    %c0_9 = arith.constant 0 : index
    %15 = vector.load %arg8[%c0_8, %c0_9] : memref<96x96xf32, #tpu.memory_space<vmem>>, vector<96x96xf32>
    %cst_10 = arith.constant dense<0.000000e+00> : vector<8x96xf32>
    %16 = tpu.matmul %12, %15, %cst_10 {dimension_numbers = #tpu.dot_dimension_numbers<[1], [0], [0], [1], [0, 0, 1, 1], [], []>} : vector<8x96xf32>, vector<96x96xf32>, vector<8x96xf32> -> vector<8x96xf32>
    %c0_11 = arith.constant 0 : index
    %c0_12 = arith.constant 0 : index
    %17 = vector.load %arg7[%c0_11, %c0_12] : memref<8x96xf32, #tpu.memory_space<vmem>>, vector<8x96xf32>
    %18 = arith.mulf %16, %17 : vector<8x96xf32>
    %19 = arith.addf %14, %18 : vector<8x96xf32>
    %20 = vector.extract_strided_slice %19 {offsets = [0, 0], sizes = [8, 32], strides = [1, 1]} : vector<8x96xf32> to vector<8x32xf32>
    %21 = vector.extract_strided_slice %19 {offsets = [0, 32], sizes = [8, 32], strides = [1, 1]} : vector<8x96xf32> to vector<8x32xf32>
    %22 = vector.extract_strided_slice %19 {offsets = [0, 64], sizes = [8, 32], strides = [1, 1]} : vector<8x96xf32> to vector<8x32xf32>
    %c0_13 = arith.constant 0 : index
    %c0_14 = arith.constant 0 : index
    %23 = vector.load %arg9[%c0_13, %c0_14] : memref<32x32xf32, #tpu.memory_space<vmem>>, vector<32x32xf32>
    %24 = tpu.concatenate %21, %21, %21, %21 in 0 : vector<8x32xf32>, vector<8x32xf32>, vector<8x32xf32>, vector<8x32xf32> -> vector<32x32xf32>
    %25 = arith.mulf %24, %23 : vector<32x32xf32>
    %26 = tpu.concatenate %22, %22, %22, %22 in 0 : vector<8x32xf32>, vector<8x32xf32>, vector<8x32xf32>, vector<8x32xf32> -> vector<32x32xf32>
    %27 = arith.mulf %26, %23 : vector<32x32xf32>
    %cst_15 = arith.constant dense<0.000000e+00> : vector<8x32xf32>
    %28 = tpu.matmul %20, %25, %cst_15 {dimension_numbers = #tpu.dot_dimension_numbers<[1], [1], [0], [0], [0, 0, 1, 0], [], []>} : vector<8x32xf32>, vector<32x32xf32>, vector<8x32xf32> -> vector<8x32xf32>
    %c0_16 = arith.constant 0 : index
    %c0_17 = arith.constant 0 : index
    %29 = vector.load %arg10[%c0_16, %c0_17] : memref<8x32xf32, #tpu.memory_space<vmem>>, vector<8x32xf32>
    %30 = arith.addf %28, %29 : vector<8x32xf32>
    %cst_18 = arith.constant dense<0xFF800000> : vector<8xf32>
    %31 = vector.multi_reduction <maximumf>, %30, %cst_18 [1] : vector<8x32xf32> to vector<8xf32>
    %32 = vector.shape_cast %31 : vector<8xf32> to vector<8x1xf32>
    %33 = vector.broadcast %32 : vector<8x1xf32> to vector<8x32xf32>
    %34 = arith.subf %30, %33 : vector<8x32xf32>
    %35 = math.exp %34 : vector<8x32xf32>
    %c0_19 = arith.constant 0 : index
    %c0_20 = arith.constant 0 : index
    %36 = vector.load %arg11[%c0_19, %c0_20] : memref<32x32xf32, #tpu.memory_space<vmem>>, vector<32x32xf32>
    %cst_21 = arith.constant dense<0.000000e+00> : vector<8x32xf32>
    %37 = tpu.matmul %35, %36, %cst_21 {dimension_numbers = #tpu.dot_dimension_numbers<[1], [0], [0], [1], [0, 0, 1, 1], [], []>} : vector<8x32xf32>, vector<32x32xf32>, vector<8x32xf32> -> vector<8x32xf32>
    %38 = tpu.reciprocal %37 {approx = true} : vector<8x32xf32> -> vector<8x32xf32>
    %39 = arith.mulf %35, %38 : vector<8x32xf32>
    %cst_22 = arith.constant dense<0.000000e+00> : vector<8x32xf32>
    %40 = tpu.matmul %39, %27, %cst_22 {dimension_numbers = #tpu.dot_dimension_numbers<[1], [0], [0], [1], [0, 0, 1, 1], [], []>} : vector<8x32xf32>, vector<32x32xf32>, vector<8x32xf32> -> vector<8x32xf32>
    %c0_23 = arith.constant 0 : index
    %c0_24 = arith.constant 0 : index
    %41 = vector.load %arg3[%c0_23, %c0_24] : memref<32x32xf32, #tpu.memory_space<vmem>>, vector<32x32xf32>
    %cst_25 = arith.constant dense<0.000000e+00> : vector<8x32xf32>
    %42 = tpu.matmul %40, %41, %cst_25 {dimension_numbers = #tpu.dot_dimension_numbers<[1], [0], [0], [1], [0, 0, 1, 1], [], []>} : vector<8x32xf32>, vector<32x32xf32>, vector<8x32xf32> -> vector<8x32xf32>
    %43 = arith.addf %0, %42 : vector<8x32xf32>
    %44 = arith.mulf %43, %43 : vector<8x32xf32>
    %cst_26 = arith.constant dense<0.000000e+00> : vector<8xf32>
    %45 = vector.multi_reduction <add>, %44, %cst_26 [1] : vector<8x32xf32> to vector<8xf32>
    %46 = vector.shape_cast %45 : vector<8xf32> to vector<8x1xf32>
    %cst_27 = arith.constant 3.200000e+01 : f32
    %47 = vector.broadcast %cst_27 : f32 to vector<8x1xf32>
    %48 = arith.divf %46, %47 : vector<8x1xf32>
    %cst_28 = arith.constant 9.99999997E-7 : f32
    %49 = vector.broadcast %cst_28 : f32 to vector<8x1xf32>
    %50 = arith.addf %48, %49 : vector<8x1xf32>
    %51 = math.rsqrt %50 : vector<8x1xf32>
    %52 = vector.broadcast %51 : vector<8x1xf32> to vector<8x32xf32>
    %53 = arith.mulf %43, %52 : vector<8x32xf32>
    %c0_29 = arith.constant 0 : index
    %c0_30 = arith.constant 0 : index
    %54 = vector.load %arg4[%c0_29, %c0_30] : memref<32x128xf32, #tpu.memory_space<vmem>>, vector<32x128xf32>
    %cst_31 = arith.constant dense<0.000000e+00> : vector<8x128xf32>
    %55 = tpu.matmul %53, %54, %cst_31 {dimension_numbers = #tpu.dot_dimension_numbers<[1], [0], [0], [1], [0, 0, 1, 1], [], []>} : vector<8x32xf32>, vector<32x128xf32>, vector<8x128xf32> -> vector<8x128xf32>
    %56 = vector.extract_strided_slice %55 {offsets = [0, 0], sizes = [8, 64], strides = [1, 1]} : vector<8x128xf32> to vector<8x64xf32>
    %57 = vector.extract_strided_slice %55 {offsets = [0, 64], sizes = [8, 64], strides = [1, 1]} : vector<8x128xf32> to vector<8x64xf32>
    %58 = arith.negf %56 : vector<8x64xf32>
    %59 = math.exp %58 : vector<8x64xf32>
    %cst_32 = arith.constant 1.000000e+00 : f32
    %60 = vector.broadcast %cst_32 : f32 to vector<8x64xf32>
    %61 = arith.addf %60, %59 : vector<8x64xf32>
    %62 = arith.divf %60, %61 : vector<8x64xf32>
    %63 = arith.mulf %56, %62 : vector<8x64xf32>
    %64 = arith.mulf %63, %57 : vector<8x64xf32>
    %c0_33 = arith.constant 0 : index
    %c0_34 = arith.constant 0 : index
    %65 = vector.load %arg5[%c0_33, %c0_34] : memref<64x32xf32, #tpu.memory_space<vmem>>, vector<64x32xf32>
    %cst_35 = arith.constant dense<0.000000e+00> : vector<8x32xf32>
    %66 = tpu.matmul %64, %65, %cst_35 {dimension_numbers = #tpu.dot_dimension_numbers<[1], [0], [0], [1], [0, 0, 1, 1], [], []>} : vector<8x64xf32>, vector<64x32xf32>, vector<8x32xf32> -> vector<8x32xf32>
    %67 = arith.addf %43, %66 : vector<8x32xf32>
    %c0_36 = arith.constant 0 : index
    %c0_37 = arith.constant 0 : index
    %68 = vector.load %arg12[%c0_36, %c0_37] : memref<8x32xf32, #tpu.memory_space<vmem>>, vector<8x32xf32>
    tpu.vector_store %arg12[%c0_36, %c0_37], %67 {strides = array<i32>} : memref<8x32xf32, #tpu.memory_space<vmem>>, vector<8x32xf32>,
    return
  }
  func.func @transform_0(%arg0: i32) -> (i32, i32) {
    %c0_i32 = arith.constant 0 : i32
    %c0_i32_0 = arith.constant 0 : i32
    return %arg0, %c0_i32 : i32, i32
  }
  func.func @transform_1(%arg0: i32) -> (i32, i32) {
    %c0_i32 = arith.constant 0 : i32
    %c0_i32_0 = arith.constant 0 : i32
    %c0_i32_1 = arith.constant 0 : i32
    return %c0_i32, %c0_i32_0 : i32, i32
  }
  func.func @transform_2(%arg0: i32) -> (i32, i32) {
    %c0_i32 = arith.constant 0 : i32
    %c0_i32_0 = arith.constant 0 : i32
    %c0_i32_1 = arith.constant 0 : i32
    return %c0_i32, %c0_i32_0 : i32, i32
  }
  func.func @transform_3(%arg0: i32) -> (i32, i32) {
    %c0_i32 = arith.constant 0 : i32
    %c0_i32_0 = arith.constant 0 : i32
    %c0_i32_1 = arith.constant 0 : i32
    return %c0_i32, %c0_i32_0 : i32, i32
  }
  func.func @transform_4(%arg0: i32) -> (i32, i32) {
    %c0_i32 = arith.constant 0 : i32
    %c0_i32_0 = arith.constant 0 : i32
    %c0_i32_1 = arith.constant 0 : i32
    return %c0_i32, %c0_i32_0 : i32, i32
  }
  func.func @transform_5(%arg0: i32) -> (i32, i32) {
    %c0_i32 = arith.constant 0 : i32
    %c0_i32_0 = arith.constant 0 : i32
    %c0_i32_1 = arith.constant 0 : i32
    return %c0_i32, %c0_i32_0 : i32, i32
  }
  func.func @transform_6(%arg0: i32) -> (i32, i32) {
    %c0_i32 = arith.constant 0 : i32
    %c0_i32_0 = arith.constant 0 : i32
    %c0_i32_1 = arith.constant 0 : i32
    return %c0_i32, %c0_i32_0 : i32, i32
  }
  func.func @transform_7(%arg0: i32) -> (i32, i32) {
    %c0_i32 = arith.constant 0 : i32
    %c0_i32_0 = arith.constant 0 : i32
    %c0_i32_1 = arith.constant 0 : i32
    return %c0_i32, %c0_i32_0 : i32, i32
  }
  func.func @transform_8(%arg0: i32) -> (i32, i32) {
    %c0_i32 = arith.constant 0 : i32
    %c0_i32_0 = arith.constant 0 : i32
    %c0_i32_1 = arith.constant 0 : i32
    return %c0_i32, %c0_i32_0 : i32, i32
  }
  func.func @transform_9(%arg0: i32) -> (i32, i32) {
    %c0_i32 = arith.constant 0 : i32
    %c0_i32_0 = arith.constant 0 : i32
    %c0_i32_1 = arith.constant 0 : i32
    return %c0_i32, %c0_i32_0 : i32, i32
  }
  func.func @transform_10(%arg0: i32) -> (i32, i32) {
    %c0_i32 = arith.constant 0 : i32
    %c0_i32_0 = arith.constant 0 : i32
    %c0_i32_1 = arith.constant 0 : i32
    return %c0_i32, %c0_i32_0 : i32, i32
  }
  func.func @transform_11(%arg0: i32) -> (i32, i32) {
    %c0_i32 = arith.constant 0 : i32
    %c0_i32_0 = arith.constant 0 : i32
    return %arg0, %c0_i32 : i32, i32
  }
}

</mosaic_0001>

<bundles_post_ra>
// kernel: mistral_block.1
= control target key start
LH: loop header
LB: loop body
LE: loop exit
PB: predicated region body
PF: predicated region fallthrough
CT: control target
= control target key end

     0   :  { %s2016_s0 = inlined_call_operand.hbm [shape: f32[16,32], index: 0, kind: input, shape index: {}]   ;;  %s2017_s1 = inlined_call_operand.hbm [shape: f32[32,96], index: 1, kind: input, shape index: {}]   ;;  %s2018_s2 = inlined_call_operand.hbm [shape: f32[32,32], index: 2, kind: input, shape index: {}]   ;;  %s2019_s3 = inlined_call_operand.hbm [shape: f32[32,128], index: 3, kind: input, shape index: {}]   ;;  %s2020_s4 = inlined_call_operand.vmem [shape: f32[64,32], index: 4, kind: input, shape index: {}]   ;;  %s2021_s5 = inlined_call_operand.hbm [shape: f32[8,96], index: 5, kind: input, shape index: {}]   ;;  %s2022_s6 = inlined_call_operand.hbm [shape: f32[8,96], index: 6, kind: input, shape index: {}]   ;;  %s2023_s7 = inlined_call_operand.vmem [shape: f32[96,96], index: 7, kind: input, shape index: {}]   ;;  %s2024_s8 = inlined_call_operand.hbm [shape: f32[32,32], index: 8, kind: input, shape index: {}]   ;;  %s2025_s9 = inlined_call_operand.hbm [shape: f32[8,32], index: 9, kind: input, shape index: {}]   ;;  %s2026_s10 = inlined_call_operand.hbm [shape: f32[32,32], index: 10, kind: input, shape index: {}]   ;;  %s2027_s11 = inlined_call_operand.hbm [shape: f32[16,32], index: 11, kind: output, shape index: {}]  }
   0x1   :  { %2028 = sst [smem:[#allocation24_spill]] %s2017_s1 }
   0x2   :  { %2029 = sst [smem:[#allocation25_spill]] %s2018_s2 }
   0x3   :  { %2030 = sst [smem:[#allocation26_spill]] %s2019_s3 }
   0x4   :  { %2031 = sst [smem:[#allocation27_spill]] %s2021_s5 }
   0x5   :  { %2032 = sst [smem:[#allocation28_spill]] %s2022_s6 }
   0x6   :  { %2033 = sst [smem:[#allocation29_spill]] %s2024_s8 }
   0x7   :  { %16 = vsyncpa [#allocation3], 0 }
   0x8   :  { %18 = vsyncpa [#allocation3 + $0x1], 0 }
   0x9   :  { %19 = vsyncpa [#allocation6], 0 }
   0xa   :  { %20 = vsyncpa [#allocation9], 0 }
   0xb   :  { %21 = vsyncpa [#allocation12], 0 }
   0xc   :  { %22 = vsyncpa [#allocation15], 0 }
   0xd   :  { %23 = vsyncpa [#allocation4], 0 }
   0xe   :  { %25 = vsyncpa [#allocation4 + $0x1], 0  ;;  %s1701_s17 = smov 0   ;;  %s1703_s18 = smov 0  }
   0xf   :  { %s1705_s19 = smov 0   ;;  %s1707_s20 = smov 0  }
  0x10 LB: > { %s2034_s1 = sld [smem:[#allocation24_spill]]  ;;  %s1725_s24 = sadd.s32 4294967295, %s1625_s20   ;;  %s1625_s20 = sphi %s1707_s20, %s2051_s20   ;;  %s1621_s19 = sphi %s1705_s19, %s2050_s19   ;;  %s1617_s18 = sphi %s1703_s18, %s2049_s18   ;;  %s1613_s17 = sphi %s1701_s17, %s2048_s17  }
  0x11   : > { %p1076_p0 = scmp.ge.s32.totalorder %s1625_s20, 1  ;;  %p52_p1 = scmp.eq.s32.totalorder %s1725_s24, 0 }
  0x12   : > { %p298_p2 = scmp.lt.s32.totalorder %s1625_s20, 3  ;;  %s1627_s26 = smov [#allocation5]  }
  0x13   : > { %s311_s27 = sshll.u32 %s1627_s26, 4  ;;  %s2036_s3 = sld [smem:[#allocation26_spill]]  ;;  %s312_s27 = int_to_ptr.vmem [resolvable:$true] %s311_s27 }
  0x14   : > { %p1730_p3 = pnand %p1076_p0, %p298_p2  ;;  %s2038_s6 = sld [smem:[#allocation28_spill]] }
  0x15   : > { %s1628_s16 = smov [#allocation8]   ;;  %s1629_s22 = smov 128  }
  0x16   : > { %s309_s23 = sshll.u32 %s2034_s1, 4  ;;  %p1152_p4 = pneg %p1730_p3  ;;  %s310_s23 = int_to_ptr.hbm [resolvable:$true] %s309_s23 }
  0x17   : > { %s339_s21 = sshll.u32 %s1628_s16, 4  ;;  %s1630_s26 = smov 8   ;;  %s340_s21 = int_to_ptr.vmem [resolvable:$true] %s339_s21 }
  0x18   : > { %p1742_p6 = pnand %p1152_p4, %p52_p1  ;;  %s396_s13 = sshll.u32 %s2025_s9, 4  ;;  %s397_s13 = int_to_ptr.hbm [resolvable:$true] %s396_s13 }
  0x19   : > { %s337_s30 = sshll.u32 %s2036_s3, 4  ;;  %s1631_s14 = smov [#allocation11]   ;;  %s338_s30 = int_to_ptr.hbm [resolvable:$true] %s337_s30 }
  0x1a   : > { %s367_s15 = sshll.u32 %s2038_s6, 4  ;;  %s369_s16 = sshll.u32 %s1631_s14, 4  ;;  %s368_s15 = int_to_ptr.hbm [resolvable:$true] %s367_s15  ;;  %s370_s16 = int_to_ptr.vmem [resolvable:$true] %s369_s16 }
  0x1b   : > { %1155 = dma.hbm_to_vmem [thread:$0]  (!%p1742_p6), %s310_s23, 512, %s312_s27, [#allocation6], %s1629_s22, %s1629_s22, %s1630_s26  }
  0x1c   : > { %1161 = dma.hbm_to_vmem [thread:$0]  (!%p1742_p6), %s338_s30, 512, %s340_s21, [#allocation9], %s1629_s22, %s1629_s22, %s1630_s26  }
  0x1d   : > { %1167 = dma.hbm_to_vmem [thread:$0]  (!%p1742_p6), %s368_s15, 128, %s370_s16, [#allocation12]  }
  0x1e   : > { %s1632_s1 = smov [#allocation14]   ;;  %s2039_s2 = sld [smem:[#allocation25_spill]] }
  0x1f   : > { %s398_s23 = sshll.u32 %s1632_s1, 4  ;;  %s2040_s5 = sld [smem:[#allocation27_spill]]  ;;  %s399_s23 = int_to_ptr.vmem [resolvable:$true] %s398_s23 }
  0x20   : > { %1173 = dma.hbm_to_vmem [thread:$0]  (!%p1742_p6), %s397_s13, 128, %s399_s23, [#allocation15]  }
  0x21   : > { %s1633_s29 = smov [#allocation7]   ;;  %s1634_s1 = smov [#allocation10]  }
  0x22   : > { %s325_s14 = sshll.u32 %s1633_s29, 4  ;;  %s357_s3 = sshll.u32 %s1634_s1, 4  ;;  %s326_s14 = int_to_ptr.vmem [resolvable:$true] %s325_s14  ;;  %s358_s3 = int_to_ptr.vmem [resolvable:$true] %s357_s3 }
  0x23   : > { %s2041_s8 = sld [smem:[#allocation29_spill]]  ;;  %s1635_s30 = smov [#allocation13]  }
  0x24   : > { %s323_s6 = sshll.u32 %s2039_s2, 4  ;;  %s383_s21 = sshll.u32 %s1635_s30, 4  ;;  %s324_s6 = int_to_ptr.hbm [resolvable:$true] %s323_s6  ;;  %s384_s21 = int_to_ptr.vmem [resolvable:$true] %s383_s21 }
  0x25   : > { %s355_s28 = sshll.u32 %s2040_s5, 4  ;;  %s1797_s1 = sadd.s32 1, %s1625_s20   ;;  %s356_s28 = int_to_ptr.hbm [resolvable:$true] %s355_s28 }
  0x26   : > { %1158 = dma.hbm_to_vmem [thread:$0]  (!%p1742_p6), %s324_s6, 512, %s326_s14, [#allocation6], %s1629_s22, %s1629_s22, %s1630_s26  }
  0x27   : > { %1164 = dma.hbm_to_vmem [thread:$0]  (!%p1742_p6), %s356_s28, 128, %s358_s3, [#allocation9]  }
  0x28   : > { %s407_s6 = sshll.u32 %s2026_s10, 4  ;;  %s1636_s28 = smov [#allocation16]   ;;  %s408_s6 = int_to_ptr.hbm [resolvable:$true] %s407_s6 }
  0x29   : > { %s381_s16 = sshll.u32 %s2041_s8, 4  ;;  %s409_s29 = sshll.u32 %s1636_s28, 4  ;;  %s382_s16 = int_to_ptr.hbm [resolvable:$true] %s381_s16  ;;  %s410_s29 = int_to_ptr.vmem [resolvable:$true] %s409_s29 }
  0x2a   : > { %1170 = dma.hbm_to_vmem [thread:$0]  (!%p1742_p6), %s382_s16, 512, %s384_s21, [#allocation12], %s1629_s22, %s1629_s22, %s1630_s26  }
  0x2b   : > { %1176 = dma.hbm_to_vmem [thread:$0]  (!%p1742_p6), %s408_s6, 512, %s410_s29, [#allocation15], %s1629_s22, %s1629_s22, %s1630_s26  }
  0x2c   : > { %s1075_s14 = sadd.s32 4294967294, %s1625_s20   ;;  %s35_s3 = ssub.s32 %s1625_s20, %s1797_s1 }
  0x2d   : > { %s38_s15 = sadd.s32 1, %s1621_s19  ;;  %p36_p7 = scmp.eq.s32.totalorder %s35_s3, 0 }
  0x2e   : > { %p45_p8 = scmp.ne.s32.totalorder %s1621_s19, %s1617_s18  ;;  %p46_p9 = scmp.eq.s32.totalorder %s1625_s20, 0 }
  0x2f   : > { %p51_p10 = scmp.ne.s32.totalorder %s1617_s18, %s1613_s17  ;;  %p285_p13 = scmp.eq.s32.totalorder %s1725_s24, 1 }
  0x30   : > { %s1808_s13 = scalar_select %p36_p7, %s1621_s19, %s38_s15  }
  0x31   : > { %p1810_p11 = por %p46_p9, %p45_p8  ;;  %p1816_p12 = por %p52_p1, %p51_p10 }
  0x32   : > { %p291_p0 = scmp.eq.s32.totalorder %s1075_s14, 1  ;;  %p1193_p2 = scmp.lt.s32.totalorder %s1625_s20, 2 }
  0x33   : > { %s423_s26 = sand.u32 1, %s1621_s19   ;;  %p1823_p4 = por %p285_p13, %p45_p8 }
  0x34   : > { %p1827_p6 = por %p291_p0, %p51_p10  ;;  %s1086_s27 = sshll.u32 %s423_s26, 3 }
  0x35   : > { %s1087_s6 = sshll.u32 %s1625_s20, 3  ;;  %s427_s29 = scalar_lea.vmem [#allocation2], %s1086_s27 }
  0x36   : > { %s431_s28 = scalar_lea.hbm %s2016_s0, %s1087_s6  ;;  %s435_s3 = sshll.u32 %s427_s29, 4  ;;  %s436_s3 = int_to_ptr.vmem [resolvable:$true] %s435_s3 }
  0x37   : > { %s433_s15 = sshll.u32 %s431_s28, 4  ;;  %p1837_p7 = pnand %p1193_p2, %p1810_p11  ;;  %s434_s15 = int_to_ptr.hbm [resolvable:$true] %s433_s15 }
  0x38   : > { %s424_s2 = scalar_lea.sflag [#allocation3], %s423_s26  ;;  %s1513_s5 = sshra.s32 %s434_s15, 4  ;;  %s1514_s5 = int_to_ptr.hbm [resolvable:$true] %s1513_s5 }
  0x39   : > { %s1515_s8 = scalar_lea.hbm %s1514_s5, 8  ;;  %p1517_p9 = pneg %p1837_p7 }
  0x3a   : > { %p1516_p8 = scmp.ne.s32.totalorder %s1514_s5, %s1515_s8  ;;  %s1520_s30 = scalar_lea.hbm %s2016_s0, 16 }
  0x3b   : > { %p1521_p11 = scmp.lt.s32.totalorder %s1514_s5, %s2016_s0  ;;  %p1522_p0 = scmp.lt.s32.totalorder %s1520_s30, %s1515_s8 }
  0x3c   : > { %p1518_p10 = pnand %p1517_p9, %p1516_p8 }
  0x3d   : > { %p1523_p2 = por %p1522_p0, %p1521_p11 }
  0x3e   : > { %p1519_p13 = pneg %p1518_p10 }
  0x40   : > { %p1524_p5 = pnand %p1523_p2, %p1519_p13 }
  0x42   : > { %1527 = shalt.err (!%p1524_p5)
}
  0x43   : > { %1180 = dma.hbm_to_vmem [thread:$0]  (!%p1837_p7), %s434_s15, 128, %s436_s3, %s424_s2  }
  0x44   : > { %444 = sbr.rel (%p1730_p3) target bundleno = 1796 (0x704), region = 64  ;;  %s1854_s26 = sand.u32 (!%p1730_p3), 1, %s1617_s18  }
  0x45   : > { %s1089_s28 = sshll.u32 (!%p1730_p3), %s1854_s26, 3  ;;  %s447_s29 = scalar_lea.sflag (!%p1730_p3), [#allocation3], %s1854_s26 }
  0x46   : > { %s450_s5 = scalar_lea.vmem (!%p1730_p3), [#allocation2], %s1089_s28 }
  0x49   : > { %1588 = dma.done.wait (%p1816_p12), %s447_s29, 128  }
  0x4a   : > { %1590 = vsyncadd (%p1816_p12), %s447_s29, 4294967168 }
  0x4b   : > { %1592 = dma.done.wait (%p52_p1), [#allocation6], 1024  }
  0x4c   : > { %1594 = vsyncadd (%p52_p1), [#allocation6], 4294966272 }
  0x4d   : > { %1596 = dma.done.wait (%p52_p1), [#allocation9], 640  }
  0x4e   : > { %1598 = vsyncadd (%p52_p1), [#allocation9], 4294966656 }
  0x4f   : > { %1600 = dma.done.wait (%p52_p1), [#allocation12], 640  }
  0x50   : > { %1602 = vsyncadd (%p52_p1), [#allocation12], 4294966656 }
  0x51   : > { %1604 = dma.done.wait (%p52_p1), [#allocation15], 640  }
  0x52   : > { %1606 = vsyncadd (%p52_p1), [#allocation15], 4294966656  ;;  %v1880_v0 = vld [vmem:[%s450_s5] sm:$0xff]  ;;  %vm532_vm0 = vcmask 261120   ;;  %v1637_v3 = vmov 32.0   ;;  %v557_v9 = vld [vmem:[#allocation5 + $0x8] sm:$0xff] }
  0x53   : > { %v531_v1 = vmul.f32 %v1880_v0, %v1880_v0  ;;  %1259 = vrcp.f32 %v1637_v3  ;;  %v559_v6 = vld [vmem:[#allocation5 + $0x18] sm:$0xff]  ;;  %v558_v8 = vld [vmem:[#allocation5 + $0x10] sm:$0xff]  ;;  %v556_v10 = vld [vmem:[#allocation5] sm:$0xff]  ;;  %s1638_s6 = smov 32   ;;  %s1639_s29 = smov 64   ;;  %vm597_vm5 = vcmask 785408  }
  0x54   : > { %575 = vmatpush.msra.mxu0 %v559_v6  ;;  %v596_v12 = vld [vmem:[%s2023_s7 + $0x58] sm:$0xff]  ;;  %v595_v13 = vld [vmem:[%s2023_s7 + $0x50] sm:$0xff]  ;;  %v594_v15 = vld [vmem:[%s2023_s7 + $0x48] sm:$0xff]  ;;  %s1640_s5 = smov 96   ;;  %vm887_vm13 = vcmask 523264   ;;  %s1113_s8 = sshll.u32 %s1725_s24, 3 }
  0x55   : > { %v533_v2 = vsel %vm532_vm0, %v531_v1, 0.0  ;;  %605 = vmatpush.msra.mxu1 %v596_v12  ;;  %v593_v16 = vld [vmem:[%s2023_s7 + $0x40] sm:$0xff]  ;;  %v627_v17 = vld [vmem:[#allocation13 + $0x18] sm:$0xff]  ;;  %v591_v22 = vld [vmem:[%s2023_s7 + $0x30] sm:$0xff]  ;;  %s924_s3 = scalar_lea.hbm %s2027_s11, %s1113_s8  ;;  %s529_s15 = scalar_lea.vmem [#allocation17], %s1089_s28 }
  0x56   : > { %534 = vadd.xlane.f32.xlu0 %v533_v2  ;;  %576 = vmatpush.msra.mxu0 %v558_v8  ;;  %v592_v19 = vld [vmem:[%s2023_s7 + $0x38] sm:$0xff]  ;;  %v590_v24 = vld [vmem:[%s2023_s7 + $0x28] sm:$0xff]  ;;  %v589_v25 = vld [vmem:[%s2023_s7 + $0x20] sm:$0xff]  ;;  %s926_s14 = sshll.u32 %s529_s15, 4  ;;  %s928_s27 = sshll.u32 %s924_s3, 4  ;;  %s927_s14 = int_to_ptr.vmem [resolvable:$true] %s926_s14  ;;  %s929_s27 = int_to_ptr.hbm [resolvable:$true] %s928_s27 }
  0x57   : > { %606 = vmatpush.msra.mxu1 %v595_v13  ;;  %v588_v26 = vld [vmem:[%s2023_s7 + $0x18] sm:$0xff]  ;;  %v587_v27 = vld [vmem:[%s2023_s7 + $0x10] sm:$0xff]  ;;  %v586_v29 = vld [vmem:[%s2023_s7 + $0x8] sm:$0xff]  ;;  %s914_s30 = scalar_lea.sflag [#allocation4], %s1854_s26  ;;  %s1557_s21 = sshra.s32 %s929_s27, 4  ;;  %s1558_s21 = int_to_ptr.hbm [resolvable:$true] %s1557_s21 }
  0x58   : > { %577 = vmatpush.msra.mxu0 %v557_v9  ;;  %v585_v31 = vld [vmem:[%s2023_s7] sm:$0xff]  ;;  %v626_v38 = vld [vmem:[#allocation13 + $0x10] sm:$0xff]  ;;  %v625_v39 = vld [vmem:[#allocation13 + $0x8] sm:$0xff]  ;;  %s1559_s12 = scalar_lea.hbm %s1558_s21, 8  ;;  %s1563_s28 = scalar_lea.hbm %s2027_s11, 16 }
  0x59   : > { %v1260_v4 = vpop.eup %1259  ;;  %607 = vmatpush.msra.mxu1 %v594_v15  ;;  %v624_v40 = vld [vmem:[#allocation13] sm:$0xff]  ;;  %636 = vrot.lane.b32.xlu1 %v626_v38, %s1638_s6  ;;  %v583_v42 = vld [vmem:[#allocation10] sm:$0xff]  ;;  %v621_v43 = vld [vmem:[#allocation11] sm:$0xff]  ;;  %p1560_p1 = scmp.ne.s32.totalorder %s1558_s21, %s1559_s12  ;;  %p1564_p12 = scmp.lt.s32.totalorder %s1558_s21, %s2027_s11 }
  0x5a   : > { %v537_v5 = vmul.f32 32.0, %v1260_v4  ;;  %578 = vmatpush.msra.mxu0 %v556_v10  ;;  %vm541_vm1 = vweird.f32 %v1260_v4  ;;  %632 = vrot.lane.b32.xlu2 %v624_v40, %s1638_s6  ;;  %v664_v10 = vld [vmem:[#allocation14] sm:$0xff]  ;;  %p1565_p7 = scmp.lt.s32.totalorder %s1563_s28, %s1559_s12 }
  0x5b   : > { %608 = vmatpush.msra.mxu1 %v593_v16  ;;  %p1561_p3 = pnand %p1560_p1, %p1823_p4 }
  0x5c   : > { %v538_v7 = vsub.f32 1.0, %v537_v5  ;;  %p1566_p8 = por %p1565_p7, %p1564_p12 }
  0x5d   : > { %609 = vmatpush.msra.mxu1 %v592_v19  ;;  %v716_v19 = vld [vmem:[#allocation16 + $0x10] sm:$0xff]  ;;  %p1562_p5 = pneg %p1561_p3 }
  0x5e   : > { %v539_v11 = vmul.f32 %v1260_v4, %v538_v7 }
  0x5f   : > { %610 = vmatpush.msra.mxu1 %v591_v22  ;;  %p1567_p9 = pnand %p1566_p8, %p1562_p5 }
  0x60   : > { %v540_v14 = vadd.f32 %v1260_v4, %v539_v11 }
  0x61   : > { %611 = vmatpush.msra.mxu1 %v590_v24  ;;  %634 = vrot.lane.b32.xlu1 %v625_v39, %s1638_s6 }
  0x62   : > { %v1897_v18 = vsel %vm541_vm1, %v1260_v4, %v540_v14 }
  0x63   : > { %612 = vmatpush.msra.mxu1 %v589_v25 }
  0x65   : > { %613 = vmatpush.msra.mxu1 %v588_v26  ;;  %v785_v26 = vld [vmem:[#allocation7 + $0x18] sm:$0xff] }
  0x67   : > { %614 = vmatpush.msra.mxu1 %v587_v27  ;;  %v784_v27 = vld [vmem:[#allocation7 + $0x10] sm:$0xff] }
  0x69   : > { %615 = vmatpush.msra.mxu1 %v586_v29  ;;  %v782_v29 = vld [vmem:[#allocation7] sm:$0xff] }
  0x6a   : > { %638 = vrot.lane.b32.xlu0 %v627_v17, %s1638_s6 }
  0x6b   : > { %616 = vmatpush.msra.mxu1 %v585_v31 }
  0x72   : > { %654 = vrot.lane.b32.xlu0 %v627_v17, %s1639_s29  ;;  %v717_v17 = vld [vmem:[#allocation16 + $0x18] sm:$0xff] }
  0x73   : > { %733 = vmatpush.msra.mxu3 %v717_v17 }
  0x75   : > { %734 = vmatpush.msra.mxu3 %v716_v19 }
  0x7a   : > { %650 = vrot.lane.b32.xlu0 %v625_v39, %s1639_s29  ;;  %v829_v39 = vld [vmem:[#allocation8 + $0x10] sm:$0xff] }
  0xb4   : > { %v633_v52 = vpop.permute.xlu2 %632 }
  0xc9   : > { %v535_v20 = vpop.xlane.xlu0 %534 }
  0xca   : > { %v543_v21 = vmul.f32 %v1897_v18, %v535_v20  ;;  %v715_v20 = vld [vmem:[#allocation16 + $0x8] sm:$0xff] }
  0xcb   : > { %v637_v46 = vpop.permute.xlu1 %636  ;;  %735 = vmatpush.msra.mxu3 %v715_v20 }
  0xcc   : > { %v544_v23 = vadd.f32 1e-06, %v543_v21  ;;  %v714_v21 = vld [vmem:[#allocation16] sm:$0xff] }
  0xcd   : > { %736 = vmatpush.msra.mxu3 %v714_v21 }
  0xce   : > { %1261 = vrsqrt.f32 %v544_v23  ;;  %vm551_vm3 = vweird.f32 %v544_v23 }
  0xcf   : > { %801 = vmatpush.msrb.mxu3 %v785_v26 }
  0xd1   : > { %802 = vmatpush.msrb.mxu3 %v784_v27 }
  0xd3   : > { %v635_v53 = vpop.permute.xlu1 %634 }
  0xd4   : > { %v1262_v28 = vpop.eup %1261 }
  0xd5   : > { %v546_v30 = vmul.f32 %v1262_v28, %v544_v23  ;;  %vm552_vm2 = vweird.f32 %v1262_v28 }
  0xd6   : > { %vm553_vm4 = vmor %vm551_vm3, %vm552_vm2 }
  0xd7   : > { %v547_v32 = vmul.f32 %v1262_v28, %v546_v30 }
  0xd9   : > { %v548_v33 = vmul.f32 0.5, %v547_v32 }
  0xdb   : > { %v549_v34 = vsub.f32 1.5, %v548_v33 }
  0xdc   : > { %v639_v49 = vpop.permute.xlu0 %638 }
  0xdd   : > { %v550_v35 = vmul.f32 %v1262_v28, %v549_v34 }
  0xdf   : > { %v554_v36 = vsel %vm553_vm4, %v1262_v28, %v550_v35  ;;  %v783_v28 = vld [vmem:[#allocation7 + $0x8] sm:$0xff] }
  0xe0   : > { %v555_v37 = vmul.f32 %v554_v36, %v1880_v0  ;;  %803 = vmatpush.msrb.mxu3 %v783_v28 }
  0xe2   : > { %1099 = vmatmul.msk.f32.vlgmr.msra.gmra.mxu0 %vm532_vm0, %v555_v37  ;;  %804 = vmatpush.msrb.mxu3 %v782_v29 }
  0xe4   : > { %v655_v60 = vpop.permute.xlu0 %654 }
  0xec   : > { %v651_v2 = vpop.permute.xlu0 %650 }
 0x15f   : > { %v580_v41 = vpop.f32.mrf.mxu0 }
 0x160   : > { %1100 = vmatmul.msk.f32.vlgmr.msra.gmra.mxu1 %vm597_vm5, %v580_v41  ;;  %v584_v45 = vmul.f32 %v583_v42, %v580_v41  ;;  %v827_v41 = vld [vmem:[#allocation8] sm:$0xff] }
 0x1dd   : > { %v618_v44 = vpop.f32.mrf.mxu1 }
 0x1de   : > { %v622_v47 = vmul.f32 %v621_v43, %v618_v44 }
 0x1e0   : > { %v623_v48 = vadd.f32 %v622_v47, %v584_v45 }
 0x1e2   : > { %v646_v50 = vmul.f32 %v637_v46, %v623_v48  ;;  %v647_v51 = vmul.f32 %v639_v49, %v623_v48  ;;  %v644_v54 = vmul.f32 %v633_v52, %v623_v48  ;;  %v645_v55 = vmul.f32 %v635_v53, %v623_v48  ;;  %v885_v52 = vld [vmem:[%s2020_s4 + $0x30] sm:$0xff]  ;;  %v884_v53 = vld [vmem:[%s2020_s4 + $0x28] sm:$0xff] }
 0x1e3   : > { %v663_v63 = vmul.f32 %v655_v60, %v623_v48  ;;  %v661_v4 = vmul.f32 %v651_v2, %v623_v48 }
 0x1e4   : > { %673 = vrot.lane.b32.xlu1 %v646_v50, %s1640_s5  ;;  %675 = vrot.lane.b32.xlu2 %v647_v51, %s1640_s5 }
 0x1ec   : > { %669 = vrot.lane.b32.xlu1 %v644_v54, %s1640_s5  ;;  %671 = vrot.lane.b32.xlu2 %v645_v55, %s1640_s5  ;;  %v883_v55 = vld [vmem:[%s2020_s4 + $0x20] sm:$0xff] }
 0x1f4   : > { %652 = vrot.lane.b32.xlu1 %v626_v38, %s1639_s29  ;;  %v830_v38 = vld [vmem:[#allocation8 + $0x18] sm:$0xff] }
 0x1fc   : > { %648 = vrot.lane.b32.xlu1 %v624_v40, %s1639_s29  ;;  %v828_v40 = vld [vmem:[#allocation8 + $0x8] sm:$0xff] }
 0x23e   : > { %v676_v56 = vpop.permute.xlu2 %675 }
 0x23f   : > { %1101 = vmatpush.xpose.msk.msra.mxu2 %vm532_vm0, %v676_v56  ;;  %v882_v56 = vld [vmem:[%s2020_s4 + $0x18] sm:$0xff] }
 0x246   : > { %v672_v58 = vpop.permute.xlu2 %671 }
 0x256   : > { %v674_v57 = vpop.permute.xlu1 %673 }
 0x257   : > { %1102 = vmatpush.xpose.msk.msra.mxu2 %vm532_vm0, %v674_v57  ;;  %v881_v57 = vld [vmem:[%s2020_s4 + $0x10] sm:$0xff] }
 0x25b   : > { %1103 = vmatpush.xpose.msk.msra.mxu2 %vm532_vm0, %v672_v58  ;;  %v880_v58 = vld [vmem:[%s2020_s4 + $0x8] sm:$0xff] }
 0x25e   : > { %v670_v59 = vpop.permute.xlu1 %669 }
 0x25f   : > { %1104 = vmatpush.xpose.msk.msra.mxu2 %vm532_vm0, %v670_v59 }
 0x262   : > { %1105 = vmatmul.msk.f32.vlgmr.msra.gmra.mxu2 %vm532_vm0, %v623_v48 }
 0x266   : > { %v653_v61 = vpop.permute.xlu1 %652 }
 0x267   : > { %v662_v62 = vmul.f32 %v653_v61, %v623_v48 }
 0x269   : > { %v1249_v1 = vpack.i.bf16 %v662_v62, %v663_v63  ;;  %v879_v62 = vld [vmem:[%s2020_s4] sm:$0xff] }
 0x26b   : > { %1250 = vrot.lane.b32.xlu0 %v1249_v1, %s1639_s29 }
 0x26e   : > { %v649_v3 = vpop.permute.xlu1 %648 }
 0x26f   : > { %v660_v5 = vmul.f32 %v649_v3, %v623_v48 }
 0x271   : > { %v1254_v6 = vpack.i.bf16 %v660_v5, %v661_v4 }
 0x273   : > { %1255 = vrot.lane.b32.xlu1 %v1254_v6, %s1639_s29 }
 0x2dd   : > { %v1251_v7 = vpop.permute.xlu0 %1250 }
 0x2de   : > { %v1252_v8 = vunpack.i.l.bf16 %v1251_v7  ;;  %v1253_v9 = vunpack.i.h.bf16 %v1251_v7 }
 0x2e0   : > { %774 = vmatpush.msrb.mxu0 %v1252_v8 }
 0x2e2   : > { %775 = vmatpush.msrb.mxu0 %v1253_v9 }
 0x2e5   : > { %v705_v11 = vpop.f32.mrf.mxu2  ;;  %v1256_v12 = vpop.permute.xlu1 %1255 }
 0x2e6   : > { %v706_v13 = vadd.f32 %v705_v11, %v664_v10  ;;  %v1257_v14 = vunpack.i.l.bf16 %v1256_v12  ;;  %v1258_v16 = vunpack.i.h.bf16 %v1256_v12 }
 0x2e8   : > { %776 = vmatpush.msrb.mxu0 %v1257_v14  ;;  %v708_v15 = vsel %vm532_vm0, %v706_v13, -inf }
 0x2e9   : > { %709 = vmax.xlane.f32.xlu2 %v708_v15 }
 0x2ea   : > { %777 = vmatpush.msrb.mxu0 %v1258_v16 }
 0x2ec   : > { %846 = vmatpush.msra.mxu0 %v830_v38 }
 0x2ee   : > { %847 = vmatpush.msra.mxu0 %v829_v39 }
 0x2f0   : > { %848 = vmatpush.msra.mxu0 %v828_v40 }
 0x2f2   : > { %849 = vmatpush.msra.mxu0 %v827_v41 }
 0x35c   : > { %v710_v22 = vpop.xlane.xlu2 %709 }
 0x35d   : > { %v711_v23 = vsub.f32 %v706_v13, %v710_v22 }
 0x35f   : > { %v712_v24 = vmul.f32 1.442695, %v711_v23 }
 0x361   : > { %1263 = vpow2.f32 %v712_v24 }
 0x367   : > { %v1264_v25 = vpop.eup %1263 }
 0x368   : > { %1106 = vmatmul.msk.f32.vlgmr.msra.gmra.mxu3 %vm532_vm0, %v1264_v25 }
 0x3eb   : > { %v738_v30 = vpop.f32.mrf.mxu3 }
 0x3ec   : > { %1265 = vrcp.f32 %v738_v30 }
 0x3f2   : > { %v1266_v31 = vpop.eup %1265 }
 0x3f3   : > { %v742_v32 = vmul.f32 %v1266_v31, %v1264_v25 }
 0x3f5   : > { %1107 = vmatmul.msk.f32.vlgmr.msrb.gmra.mxu0 %vm532_vm0, %v742_v32 }
 0x472   : > { %v779_v33 = vpop.f32.mrf.mxu0 }
 0x473   : > { %1108 = vmatmul.msk.f32.vlgmr.msrb.gmra.mxu3 %vm532_vm0, %v779_v33 }
 0x4f6   : > { %v806_v34 = vpop.f32.mrf.mxu3 }
 0x4f7   : > { %v1946_v35 = vadd.f32 %v806_v34, %v1880_v0 }
 0x4f9   : > { %v810_v36 = vmul.f32 %v1946_v35, %v1946_v35 }
 0x4fb   : > { %v811_v37 = vsel %vm532_vm0, %v810_v36, 0.0 }
 0x4fc   : > { %812 = vadd.xlane.f32.xlu0 %v811_v37 }
 0x56f   : > { %v813_v42 = vpop.xlane.xlu0 %812 }
 0x570   : > { %v814_v43 = vmul.f32 %v813_v42, %v1897_v18  ;;  %v886_v18 = vld [vmem:[%s2020_s4 + $0x38] sm:$0xff] }
 0x571   : > { %899 = vmatpush.msrb.mxu2 %v886_v18 }
 0x572   : > { %v815_v44 = vadd.f32 1e-06, %v814_v43 }
 0x573   : > { %900 = vmatpush.msrb.mxu2 %v885_v52 }
 0x574   : > { %1267 = vrsqrt.f32 %v815_v44  ;;  %vm822_vm7 = vweird.f32 %v815_v44 }
 0x575   : > { %901 = vmatpush.msrb.mxu2 %v884_v53 }
 0x577   : > { %902 = vmatpush.msrb.mxu2 %v883_v55 }
 0x579   : > { %903 = vmatpush.msrb.mxu2 %v882_v56 }
 0x57a   : > { %v1268_v0 = vpop.eup %1267 }
 0x57b   : > { %v817_v45 = vmul.f32 %v1268_v0, %v815_v44  ;;  %vm823_vm6 = vweird.f32 %v1268_v0  ;;  %904 = vmatpush.msrb.mxu2 %v881_v57 }
 0x57c   : > { %vm824_vm8 = vmor %vm822_vm7, %vm823_vm6 }
 0x57d   : > { %v818_v46 = vmul.f32 %v1268_v0, %v817_v45  ;;  %905 = vmatpush.msrb.mxu2 %v880_v58 }
 0x57f   : > { %v819_v47 = vmul.f32 0.5, %v818_v46  ;;  %906 = vmatpush.msrb.mxu2 %v879_v62 }
 0x581   : > { %v820_v48 = vsub.f32 1.5, %v819_v47 }
 0x583   : > { %v821_v49 = vmul.f32 %v1268_v0, %v820_v48 }
 0x585   : > { %v825_v50 = vsel %vm824_vm8, %v1268_v0, %v821_v49 }
 0x586   : > { %v826_v51 = vmul.f32 %v825_v50, %v1946_v35 }
 0x588   : > { %1109 = vmatmul.msk.f32.vlgmr.msra.gmra.mxu0 %vm532_vm0, %v826_v51 }
 0x605   : > { %v851_v54 = vpop.f32.mrf.mxu0 }
 0x606   : > { %875 = vrot.lane.b32.xlu1 %v851_v54, %s1639_s29  ;;  %v1110_v59 = vmul.f32 -1.442695, %v851_v54 }
 0x608   : > { %1269 = vpow2.f32 %v1110_v59 }
 0x60e   : > { %v1270_v60 = vpop.eup %1269 }
 0x60f   : > { %v857_v61 = vadd.f32 1.0, %v1270_v60 }
 0x611   : > { %1271 = vrcp.f32 %v857_v61  ;;  %v869_v5 = vand.u32 2147483648, %v857_v61  ;;  %vm863_vm10 = vweird.f32 %v857_v61  ;;  %v867_v6 = vand.u32 2147483647, %v857_v61 }
 0x613   : > { %v870_v8 = vor.u32 1.1754944e-38, %v869_v5  ;;  %vm868_vm12 = vcmp.eq.f32.partialorder %v867_v6, 8.507059e+37 }
 0x617   : > { %v1272_v63 = vpop.eup %1271 }
 0x618   : > { %v859_v1 = vmul.f32 %v1272_v63, %v857_v61  ;;  %vm864_vm9 = vweird.f32 %v1272_v63 }
 0x619   : > { %vm865_vm11 = vmor %vm863_vm10, %vm864_vm9 }
 0x61a   : > { %v860_v2 = vsub.f32 1.0, %v859_v1 }
 0x61c   : > { %v861_v3 = vmul.f32 %v1272_v63, %v860_v2 }
 0x61e   : > { %v862_v4 = vadd.f32 %v1272_v63, %v861_v3 }
 0x620   : > { %v866_v7 = vsel %vm865_vm11, %v1272_v63, %v862_v4 }
 0x621   : > { %v871_v9 = vsel %vm868_vm12, %v870_v8, %v866_v7 }
 0x622   : > { %v873_v10 = vmul.f32 %v871_v9, %v851_v54 }
 0x678   : > { %v876_v11 = vpop.permute.xlu1 %875 }
 0x679   : > { %v878_v12 = vmul.f32 %v876_v11, %v873_v10 }
 0x67b   : > { %1111 = vmatmul.msk.f32.vlgmr.msrb.gmra.mxu2 %vm887_vm13, %v878_v12 }
 0x6fe   : > { %v908_v13 = vpop.f32.mrf.mxu2 }
 0x6ff   : > { %v911_v14 = vadd.f32 %v908_v13, %v1946_v35 }
 0x701   : > { %912 = vst.msk [vmem:[%s529_s15] sm:$0xff] %vm532_vm0, %v911_v14 }
 0x702   : > { %1570 = shalt.err (!%p1567_p9)
}
 0x703   : > { %1150 = dma.vmem_to_hbm [thread:$0]  (%p1823_p4), %s927_s14, 128, %s929_s27, %s914_s30  }
 0x704 PF: > { %s940_s26 = sand.u32 1, %s1613_s17   ;;  %p2047_p10 = scmp.ge.s32.totalorder %s1625_s20, 2 }
 0x705   : > { %s941_s2 = scalar_lea.sflag [#allocation4], %s940_s26 }
 0x706   : > { %p1182_p13 = pnand %p2047_p10, %p1827_p6 }
 0x708   : > { %p1183_p11 = pneg %p1182_p13 }
 0x70a   : > { %1608 = dma.done.wait (%p1183_p11), %s941_s2, 128  }
 0x70b   : > { %1610 = vsyncadd (%p1183_p11), %s941_s2, 4294967168  ;;  %p28_p0 = scmp.ge.s32.totalorder %s1797_s1, 4   ;;  %s2048_s17 = smov %s1617_s18 }
 0x70c   : > { %s2049_s18 = smov %s1621_s19  ;;  %s2050_s19 = smov %s1808_s13 }
 0x70d   : > { %s2051_s20 = smov %s1797_s1  ;;  %30 = sbr.rel (!%p28_p0) target bundleno = 16 (0x10), region = 141 }
 0x712   :  { %947 = vsyncpa [#allocation3], 1 }
 0x713   :  { %949 = vsyncpa [#allocation3 + $0x1], 1 }
 0x714   :  { %950 = vsyncpa [#allocation6], 1 }
 0x715   :  { %951 = vsyncpa [#allocation9], 1 }
 0x716   :  { %952 = vsyncpa [#allocation12], 1 }
 0x717   :  { %953 = vsyncpa [#allocation15], 1 }
 0x718   :  { %954 = vsyncpa [#allocation4], 1 }
 0x719   :  { %956 = vsyncpa [#allocation4 + $0x1], 1 }

</bundles_post_ra>
